<compile_context>
chip_gen: v5e
topology: v5e:2x2
jax: 0.10.0
libtpu: 0.0.40
codegen_flags: <defaults>
</compile_context>

<pallas_src>
import functools

import numpy as np
import jax
import jax.numpy as jnp
from jax.experimental import pallas as pl
from jax.experimental.pallas import tpu as pltpu

EPS = 1e-5
TILE_BYTE_CAP = 6 * 1024 * 1024      # ~6 MiB of x per tile (v6e/v7x sweet spot)
VMEM_LIMIT = 48 * 1024 * 1024        # < v7x's 64 MiB physical VMEM


def _round_up(x, m):
    return ((x + m - 1) // m) * m


def _divisors(n):
    out = set()
    i = 1
    while i * i <= n:
        if n % i == 0:
            out.add(i)
            out.add(n // i)
        i += 1
    return sorted(out)


def _choose_tiles(n, c, l, itemsize):
    """Pick (tn, lt): tn | n samples per tile, lt | l spatial chunk length."""
    c_pad = _round_up(max(c, 1), 8)                  # VMEM sublane padding

    def slab_bytes(ll):                              # VMEM bytes of one sample slab
        return c_pad * _round_up(ll, 128) * itemsize

    # Chunk L only when a single full-L sample slab busts the byte cap.
    lt = l
    if slab_bytes(l) > TILE_BYTE_CAP and l % 128 == 0:
        best = None
        for k in _divisors(l // 128):
            cand = k * 128
            if slab_bytes(cand) <= TILE_BYTE_CAP and (best is None or cand > best):
                best = cand
        if best is not None:
            lt = best
    # TODO(synk): a very large L that is not a multiple of 128 falls back to a
    # single full-L chunk and relies on the raised vmem limit.

    max_tn = max(1, TILE_BYTE_CAP // slab_bytes(lt))
    cap_tn = n if n < 2 else max(1, n // 2)          # >=2 N tiles -> v7x megacore
    tn = 1
    for d in _divisors(n):
        if d <= min(max_tn, cap_tn) and d > tn:
            tn = d
    return tn, lt


# ---------------------------------------------------------------------------
# Pass 1 (stats folded in): accumulate per-domain sums via MXU dots with the
# one-hot domain matrix, finalize per-domain fused scale/offset a_g, c_g.
#   a_g = w * rsqrt(var + eps),  c_g = b - mean * a_g
# ---------------------------------------------------------------------------
def _domain_stats_kernel(x_ref, oh_ref, w_ref, b_ref, ag_ref, cg_ref,
                         s1_acc, s2_acc, cnt_acc, *, l_total, eps):
    i = pl.program_id(0)
    l = pl.program_id(1)
    first = jnp.logical_and(i == 0, l == 0)
    last = jnp.logical_and(i == pl.num_programs(0) - 1,
                           l == pl.num_programs(1) - 1)

    @pl.when(first)
    def _():
        s1_acc[...] = jnp.zeros_like(s1_acc)
        s2_acc[...] = jnp.zeros_like(s2_acc)
        cnt_acc[...] = jnp.zeros_like(cnt_acc)

    x = x_ref[...].astype(jnp.float32)                 # [tn, C, lt] (f32 in-register)
    oh = oh_ref[...][:, 0, :].astype(jnp.float32)      # [tn, G]

    ps1 = jnp.sum(x, axis=2)                           # [tn, C]
    ps2 = jnp.sum(x * x, axis=2)                       # [tn, C]

    dn = (((0,), (0,)), ((), ()))                      # contract over the sample axis
    s1_acc[...] += jax.lax.dot_general(oh, ps1, dn,
                                       preferred_element_type=jnp.float32)
    s2_acc[...] += jax.lax.dot_general(oh, ps2, dn,
                                       preferred_element_type=jnp.float32)

    @pl.when(l == 0)                                   # count each sample once
    def _():
        ones = jnp.ones((oh.shape[0], 1), jnp.float32)
        cnt_acc[...] += jax.lax.dot_general(oh, ones, dn,
                                            preferred_element_type=jnp.float32)

    @pl.when(last)
    def _():
        # TODO(synk): single-pass E[x^2]-mean^2 can lose precision when
        # |mean| >> std; a shifted/Welford-style combine would be more robust.
        cnt = jnp.maximum(cnt_acc[...] * l_total, 1.0)           # [G, 1]
        mean = s1_acc[...] / cnt                                 # [G, C]
        var = jnp.maximum(s2_acc[...] / cnt - mean * mean, 0.0)
        inv = jax.lax.rsqrt(var + eps)
        a_g = w_ref[...] * inv
        ag_ref[...] = a_g
        cg_ref[...] = b_ref[...] - mean * a_g


# ---------------------------------------------------------------------------
# Pass 2: y = x * a + c.  a, c gathered per tile with a tiny MXU dot against
# the one-hot tile; each output element written exactly once.
# ---------------------------------------------------------------------------
def _normalize_kernel(x_ref, oh_ref, ag_ref, cg_ref, o_ref):
    x = x_ref[...].astype(jnp.float32)                 # [tn, C, lt]
    oh = oh_ref[...][:, 0, :].astype(jnp.float32)      # [tn, G]
    a = jnp.dot(oh, ag_ref[...], preferred_element_type=jnp.float32)  # [tn, C]
    c = jnp.dot(oh, cg_ref[...], preferred_element_type=jnp.float32)  # [tn, C]
    o_ref[...] = (x * a[:, :, None] + c[:, :, None]).astype(o_ref.dtype)


# ---------------------------------------------------------------------------
# Wrapper
# ---------------------------------------------------------------------------
def domain_batchnorm(x_nchw, d, domains, weight, bias, *, eps=EPS):
    """
    x_nchw : [N, C, H, W] float32 / bfloat16
    d      : [N] int32 domain label per sample
    domains: [G] int32 unique domain values (host-computed, like d.unique())
    weight : [G, C] per-domain scale
    bias   : [G, C] per-domain shift
    """
    N, C, H, W = x_nchw.shape
    L = H * W
    G = int(domains.shape[0])
    out_dtype = x_nchw.dtype

    x3 = x_nchw.reshape(N, C, L)                       # contiguous -> no copy

    # One-hot domain membership as [N, 1, G]: the sample axis is a leading
    # (unconstrained) block dim, last two dims are full.  Samples whose label
    # is absent from `domains` get an all-zero row (cannot happen when
    # domains = unique(d), matching the PyTorch module).
    onehot = (d.reshape(N, 1).astype(jnp.int32) ==
              domains.reshape(1, G).astype(jnp.int32)).astype(jnp.float32)
    onehot3 = onehot.reshape(N, 1, G)

    tn, lt = _choose_tiles(N, C, L, x_nchw.dtype.itemsize)
    grid = (N // tn, L // lt)

    w32 = weight.astype(jnp.float32)
    b32 = bias.astype(jnp.float32)

    # ---- pass 1: per-domain fused scale/offset [G, C] -----------------------
    a_g, c_g = pl.pallas_call(
        functools.partial(_domain_stats_kernel, l_total=float(L), eps=float(eps)),
        out_shape=(jax.ShapeDtypeStruct((G, C), jnp.float32),
                   jax.ShapeDtypeStruct((G, C), jnp.float32)),
        grid=grid,
        in_specs=[
            pl.BlockSpec((tn, C, lt), lambda i, l: (i, 0, l)),   # x
            pl.BlockSpec((tn, 1, G), lambda i, l: (i, 0, 0)),    # one-hot
            pl.BlockSpec((G, C), lambda i, l: (0, 0)),           # weight
            pl.BlockSpec((G, C), lambda i, l: (0, 0)),           # bias
        ],
        out_specs=(pl.BlockSpec((G, C), lambda i, l: (0, 0)),
                   pl.BlockSpec((G, C), lambda i, l: (0, 0))),
        scratch_shapes=[pltpu.VMEM((G, C), jnp.float32),
                        pltpu.VMEM((G, C), jnp.float32),
                        pltpu.VMEM((G, 1), jnp.float32)],
        compiler_params=pltpu.CompilerParams(
            dimension_semantics=("arbitrary", "arbitrary"),
            vmem_limit_bytes=VMEM_LIMIT),
    )(x3, onehot3, w32, b32)

    # ---- pass 2: normalize; each output element written exactly once --------
    y = pl.pallas_call(
        _normalize_kernel,
        out_shape=jax.ShapeDtypeStruct((N, C, L), out_dtype),
        grid=grid,
        in_specs=[
            pl.BlockSpec((tn, C, lt), lambda i, l: (i, 0, l)),   # x
            pl.BlockSpec((tn, 1, G), lambda i, l: (i, 0, 0)),    # one-hot
            pl.BlockSpec((G, C), lambda i, l: (0, 0)),           # a_g
            pl.BlockSpec((G, C), lambda i, l: (0, 0)),           # c_g
        ],
        out_specs=pl.BlockSpec((tn, C, lt), lambda i, l: (i, 0, l)),
        compiler_params=pltpu.CompilerParams(
            dimension_semantics=("parallel", "parallel"),
            vmem_limit_bytes=VMEM_LIMIT),
    )(x3, onehot3, a_g, c_g)

    return y.reshape(N, C, H, W)


# ---------------------------------------------------------------------------
# Pure numpy reference mirroring the PyTorch forward.
# ---------------------------------------------------------------------------
def _reference(x_nchw, d, domains, weight, bias, eps=EPS):
    x = np.asarray(x_nchw, dtype=np.float64)
    d = np.asarray(d)
    out = np.zeros_like(x)
    for gi, dom in enumerate(np.asarray(domains)):
        sel = d == dom
        if not np.any(sel):
            continue
        xs = x[sel]                                    # [n_g, C, H, W]
        mean = xs.mean(axis=(0, 2, 3), keepdims=True)
        var = xs.var(axis=(0, 2, 3), keepdims=True)    # biased, as in BN training
        w = np.asarray(weight)[gi][None, :, None, None]
        b = np.asarray(bias)[gi][None, :, None, None]
        out[sel] = (xs - mean) / np.sqrt(var + eps) * w + b
    return out


if __name__ == "__main__":
    key = jax.random.PRNGKey(0)
    N, C, H, W = 8, 4, 16, 16
    G = 2

    kx, _ = jax.random.split(key)
    x = jax.random.normal(kx, (N, C, H, W), dtype=jnp.float32)

    # two domains, interleaved sample assignment
    d = jnp.array([0, 1, 0, 1, 0, 1, 0, 1], dtype=jnp.int32)
    domains = jnp.array([0, 1], dtype=jnp.int32)       # = torch d.unique()

    # deterministic per-domain affine parameters, shapes [G, C]
    weight = 1.0 + 0.1 * jnp.arange(G * C, dtype=jnp.float32).reshape(G, C)
    bias = 0.01 * jnp.arange(G * C, dtype=jnp.float32).reshape(G, C)

    y = domain_batchnorm(x, d, domains, weight, bias)
    y = jax.block_until_ready(y)

    y_ref = _reference(x, d, domains, weight, bias)
    np.testing.assert_allclose(np.asarray(y), y_ref, rtol=1e-4, atol=1e-4)

    print("KERNEL_OK")
</pallas_src>

<mosaic_0001>
module attributes {stable_mosaic.version = 11 : i64} {
  func.func @_domain_stats_kernel(%arg0: i32, %arg1: i32, %arg2: memref<4x4x256xf32, #tpu.memory_space<vmem>>, %arg3: memref<4x1x2xf32, #tpu.memory_space<vmem>>, %arg4: memref<2x4xf32, #tpu.memory_space<vmem>>, %arg5: memref<2x4xf32, #tpu.memory_space<vmem>>, %arg6: memref<2x4xf32, #tpu.memory_space<vmem>>, %arg7: memref<2x4xf32, #tpu.memory_space<vmem>>, %arg8: memref<2x4xf32, #tpu.memory_space<vmem>>, %arg9: memref<2x4xf32, #tpu.memory_space<vmem>>, %arg10: memref<2x1xf32, #tpu.memory_space<vmem>>) attributes {dimension_semantics = [#tpu.dimension_semantics<arbitrary>, #tpu.dimension_semantics<arbitrary>], iteration_bounds = array<i64: 2, 1>, scalar_prefetch = 0 : i64, scratch_operands = 3 : i64, tpu.core_type = #tpu.core_type<tc>, window_params = [{transform_indices = @transform_0, window_bounds = array<i64: 4, 4, 256>}, {transform_indices = @transform_1, window_bounds = array<i64: 4, 1, 2>}, {pipeline_mode = #tpu.pipeline_mode<synchronous>, transform_indices = @transform_2, window_bounds = array<i64: 2, 4>}, {pipeline_mode = #tpu.pipeline_mode<synchronous>, transform_indices = @transform_3, window_bounds = array<i64: 2, 4>}, {pipeline_mode = #tpu.pipeline_mode<synchronous>, transform_indices = @transform_4, window_bounds = array<i64: 2, 4>}, {pipeline_mode = #tpu.pipeline_mode<synchronous>, transform_indices = @transform_5, window_bounds = array<i64: 2, 4>}]} {
    %c0_i32 = arith.constant 0 : i32
    %0 = arith.cmpi eq, %arg0, %c0_i32 : i32
    %c0_i32_0 = arith.constant 0 : i32
    %1 = arith.cmpi eq, %arg1, %c0_i32_0 : i32
    %2 = arith.andi %0, %1 : i1
    %c1_i32 = arith.constant 1 : i32
    %3 = arith.cmpi eq, %arg0, %c1_i32 : i32
    %c0_i32_1 = arith.constant 0 : i32
    %4 = arith.cmpi eq, %arg1, %c0_i32_1 : i32
    %5 = arith.andi %3, %4 : i1
    %6 = arith.extui %2 : i1 to i32
    %c0_i32_2 = arith.constant 0 : i32
    %7 = arith.cmpi ne, %6, %c0_i32_2 : i32
    scf.if %7 {
      %cst_22 = arith.constant 0.000000e+00 : f32
      %27 = vector.broadcast %cst_22 : f32 to vector<2x4xf32>
      %c0_23 = arith.constant 0 : index
      %c0_24 = arith.constant 0 : index
      %28 = vector.load %arg8[%c0_23, %c0_24] : memref<2x4xf32, #tpu.memory_space<vmem>>, vector<2x4xf32>
      tpu.vector_store %arg8[%c0_23, %c0_24], %27 {strides = array<i32>} : memref<2x4xf32, #tpu.memory_space<vmem>>, vector<2x4xf32>,
      %cst_25 = arith.constant 0.000000e+00 : f32
      %29 = vector.broadcast %cst_25 : f32 to vector<2x4xf32>
      %c0_26 = arith.constant 0 : index
      %c0_27 = arith.constant 0 : index
      %30 = vector.load %arg9[%c0_26, %c0_27] : memref<2x4xf32, #tpu.memory_space<vmem>>, vector<2x4xf32>
      tpu.vector_store %arg9[%c0_26, %c0_27], %29 {strides = array<i32>} : memref<2x4xf32, #tpu.memory_space<vmem>>, vector<2x4xf32>,
      %cst_28 = arith.constant 0.000000e+00 : f32
      %31 = vector.broadcast %cst_28 : f32 to vector<2x1xf32>
      %c0_29 = arith.constant 0 : index
      %c0_30 = arith.constant 0 : index
      %32 = vector.load %arg10[%c0_29, %c0_30] : memref<2x1xf32, #tpu.memory_space<vmem>>, vector<2x1xf32>
      tpu.vector_store %arg10[%c0_29, %c0_30], %31 {strides = array<i32>} : memref<2x1xf32, #tpu.memory_space<vmem>>, vector<2x1xf32>,
    } else {
    }
    %c0 = arith.constant 0 : index
    %c0_3 = arith.constant 0 : index
    %c0_4 = arith.constant 0 : index
    %8 = vector.load %arg2[%c0, %c0_3, %c0_4] : memref<4x4x256xf32, #tpu.memory_space<vmem>>, vector<4x4x256xf32>
    %c0_5 = arith.constant 0 : index
    %c0_6 = arith.constant 0 : index
    %c0_7 = arith.constant 0 : index
    %9 = vector.load %arg3[%c0_5, %c0_6, %c0_7] : memref<4x1x2xf32, #tpu.memory_space<vmem>>, vector<4x1x2xf32>
    %10 = vector.shape_cast %9 : vector<4x1x2xf32> to vector<4x2xf32>
    %cst = arith.constant dense<0.000000e+00> : vector<4x4xf32>
    %11 = vector.multi_reduction <add>, %8, %cst [2] : vector<4x4x256xf32> to vector<4x4xf32>
    %12 = arith.mulf %8, %8 : vector<4x4x256xf32>
    %cst_8 = arith.constant dense<0.000000e+00> : vector<4x4xf32>
    %13 = vector.multi_reduction <add>, %12, %cst_8 [2] : vector<4x4x256xf32> to vector<4x4xf32>
    %c0_9 = arith.constant 0 : index
    %c0_10 = arith.constant 0 : index
    %14 = vector.load %arg8[%c0_9, %c0_10] : memref<2x4xf32, #tpu.memory_space<vmem>>, vector<2x4xf32>
    %cst_11 = arith.constant dense<0.000000e+00> : vector<2x4xf32>
    %15 = tpu.matmul %10, %11, %cst_11 {dimension_numbers = #tpu.dot_dimension_numbers<[0], [0], [1], [1], [0, 1, 1, 1], [], []>} : vector<4x2xf32>, vector<4x4xf32>, vector<2x4xf32> -> vector<2x4xf32>
    %16 = arith.addf %14, %15 : vector<2x4xf32>
    %c0_12 = arith.constant 0 : index
    %c0_13 = arith.constant 0 : index
    %17 = vector.load %arg8[%c0_12, %c0_13] : memref<2x4xf32, #tpu.memory_space<vmem>>, vector<2x4xf32>
    tpu.vector_store %arg8[%c0_12, %c0_13], %16 {strides = array<i32>} : memref<2x4xf32, #tpu.memory_space<vmem>>, vector<2x4xf32>,
    %c0_14 = arith.constant 0 : index
    %c0_15 = arith.constant 0 : index
    %18 = vector.load %arg9[%c0_14, %c0_15] : memref<2x4xf32, #tpu.memory_space<vmem>>, vector<2x4xf32>
    %cst_16 = arith.constant dense<0.000000e+00> : vector<2x4xf32>
    %19 = tpu.matmul %10, %13, %cst_16 {dimension_numbers = #tpu.dot_dimension_numbers<[0], [0], [1], [1], [0, 1, 1, 1], [], []>} : vector<4x2xf32>, vector<4x4xf32>, vector<2x4xf32> -> vector<2x4xf32>
    %20 = arith.addf %18, %19 : vector<2x4xf32>
    %c0_17 = arith.constant 0 : index
    %c0_18 = arith.constant 0 : index
    %21 = vector.load %arg9[%c0_17, %c0_18] : memref<2x4xf32, #tpu.memory_space<vmem>>, vector<2x4xf32>
    tpu.vector_store %arg9[%c0_17, %c0_18], %20 {strides = array<i32>} : memref<2x4xf32, #tpu.memory_space<vmem>>, vector<2x4xf32>,
    %c0_i32_19 = arith.constant 0 : i32
    %22 = arith.cmpi eq, %arg1, %c0_i32_19 : i32
    %23 = arith.extui %22 : i1 to i32
    %c0_i32_20 = arith.constant 0 : i32
    %24 = arith.cmpi ne, %23, %c0_i32_20 : i32
    scf.if %24 {
      %cst_22 = arith.constant 1.000000e+00 : f32
      %27 = vector.broadcast %cst_22 : f32 to vector<4x1xf32>
      %c0_23 = arith.constant 0 : index
      %c0_24 = arith.constant 0 : index
      %28 = vector.load %arg10[%c0_23, %c0_24] : memref<2x1xf32, #tpu.memory_space<vmem>>, vector<2x1xf32>
      %cst_25 = arith.constant dense<0.000000e+00> : vector<2x1xf32>
      %29 = tpu.matmul %10, %27, %cst_25 {dimension_numbers = #tpu.dot_dimension_numbers<[0], [0], [1], [1], [0, 1, 1, 1], [], []>} : vector<4x2xf32>, vector<4x1xf32>, vector<2x1xf32> -> vector<2x1xf32>
      %30 = arith.addf %28, %29 : vector<2x1xf32>
      %c0_26 = arith.constant 0 : index
      %c0_27 = arith.constant 0 : index
      %31 = vector.load %arg10[%c0_26, %c0_27] : memref<2x1xf32, #tpu.memory_space<vmem>>, vector<2x1xf32>
      tpu.vector_store %arg10[%c0_26, %c0_27], %30 {strides = array<i32>} : memref<2x1xf32, #tpu.memory_space<vmem>>, vector<2x1xf32>,
    } else {
    }
    %25 = arith.extui %5 : i1 to i32
    %c0_i32_21 = arith.constant 0 : i32
    %26 = arith.cmpi ne, %25, %c0_i32_21 : i32
    scf.if %26 {
      %c0_22 = arith.constant 0 : index
      %c0_23 = arith.constant 0 : index
      %27 = vector.load %arg10[%c0_22, %c0_23] : memref<2x1xf32, #tpu.memory_space<vmem>>, vector<2x1xf32>
      %cst_24 = arith.constant 2.560000e+02 : f32
      %28 = vector.broadcast %cst_24 : f32 to vector<2x1xf32>
      %29 = arith.mulf %27, %28 : vector<2x1xf32>
      %cst_25 = arith.constant 1.000000e+00 : f32
      %30 = vector.broadcast %cst_25 : f32 to vector<2x1xf32>
      %31 = arith.maximumf %29, %30 : vector<2x1xf32>
      %c0_26 = arith.constant 0 : index
      %c0_27 = arith.constant 0 : index
      %32 = vector.load %arg8[%c0_26, %c0_27] : memref<2x4xf32, #tpu.memory_space<vmem>>, vector<2x4xf32>
      %33 = vector.broadcast %31 : vector<2x1xf32> to vector<2x4xf32>
      %34 = arith.divf %32, %33 : vector<2x4xf32>
      %c0_28 = arith.constant 0 : index
      %c0_29 = arith.constant 0 : index
      %35 = vector.load %arg9[%c0_28, %c0_29] : memref<2x4xf32, #tpu.memory_space<vmem>>, vector<2x4xf32>
      %36 = vector.broadcast %31 : vector<2x1xf32> to vector<2x4xf32>
      %37 = arith.divf %35, %36 : vector<2x4xf32>
      %38 = arith.mulf %34, %34 : vector<2x4xf32>
      %39 = arith.subf %37, %38 : vector<2x4xf32>
      %cst_30 = arith.constant 0.000000e+00 : f32
      %40 = vector.broadcast %cst_30 : f32 to vector<2x4xf32>
      %41 = arith.maximumf %39, %40 : vector<2x4xf32>
      %cst_31 = arith.constant 9.99999974E-6 : f32
      %42 = vector.broadcast %cst_31 : f32 to vector<2x4xf32>
      %43 = arith.addf %41, %42 : vector<2x4xf32>
      %44 = math.rsqrt %43 : vector<2x4xf32>
      %c0_32 = arith.constant 0 : index
      %c0_33 = arith.constant 0 : index
      %45 = vector.load %arg4[%c0_32, %c0_33] : memref<2x4xf32, #tpu.memory_space<vmem>>, vector<2x4xf32>
      %46 = arith.mulf %45, %44 : vector<2x4xf32>
      %c0_34 = arith.constant 0 : index
      %c0_35 = arith.constant 0 : index
      %47 = vector.load %arg6[%c0_34, %c0_35] : memref<2x4xf32, #tpu.memory_space<vmem>>, vector<2x4xf32>
      tpu.vector_store %arg6[%c0_34, %c0_35], %46 {strides = array<i32>} : memref<2x4xf32, #tpu.memory_space<vmem>>, vector<2x4xf32>,
      %c0_36 = arith.constant 0 : index
      %c0_37 = arith.constant 0 : index
      %48 = vector.load %arg5[%c0_36, %c0_37] : memref<2x4xf32, #tpu.memory_space<vmem>>, vector<2x4xf32>
      %49 = arith.mulf %34, %46 : vector<2x4xf32>
      %50 = arith.subf %48, %49 : vector<2x4xf32>
      %c0_38 = arith.constant 0 : index
      %c0_39 = arith.constant 0 : index
      %51 = vector.load %arg7[%c0_38, %c0_39] : memref<2x4xf32, #tpu.memory_space<vmem>>, vector<2x4xf32>
      tpu.vector_store %arg7[%c0_38, %c0_39], %50 {strides = array<i32>} : memref<2x4xf32, #tpu.memory_space<vmem>>, vector<2x4xf32>,
    } else {
    }
    return
  }
  func.func @transform_0(%arg0: i32, %arg1: i32) -> (i32, i32, i32) {
    %c0_i32 = arith.constant 0 : i32
    %c0_i32_0 = arith.constant 0 : i32
    return %arg0, %c0_i32, %arg1 : i32, i32, i32
  }
  func.func @transform_1(%arg0: i32, %arg1: i32) -> (i32, i32, i32) {
    %c0_i32 = arith.constant 0 : i32
    %c0_i32_0 = arith.constant 0 : i32
    %c0_i32_1 = arith.constant 0 : i32
    return %arg0, %c0_i32, %c0_i32_0 : i32, i32, i32
  }
  func.func @transform_2(%arg0: i32, %arg1: i32) -> (i32, i32) {
    %c0_i32 = arith.constant 0 : i32
    %c0_i32_0 = arith.constant 0 : i32
    %c0_i32_1 = arith.constant 0 : i32
    return %c0_i32, %c0_i32_0 : i32, i32
  }
  func.func @transform_3(%arg0: i32, %arg1: i32) -> (i32, i32) {
    %c0_i32 = arith.constant 0 : i32
    %c0_i32_0 = arith.constant 0 : i32
    %c0_i32_1 = arith.constant 0 : i32
    return %c0_i32, %c0_i32_0 : i32, i32
  }
  func.func @transform_4(%arg0: i32, %arg1: i32) -> (i32, i32) {
    %c0_i32 = arith.constant 0 : i32
    %c0_i32_0 = arith.constant 0 : i32
    %c0_i32_1 = arith.constant 0 : i32
    return %c0_i32, %c0_i32_0 : i32, i32
  }
  func.func @transform_5(%arg0: i32, %arg1: i32) -> (i32, i32) {
    %c0_i32 = arith.constant 0 : i32
    %c0_i32_0 = arith.constant 0 : i32
    %c0_i32_1 = arith.constant 0 : i32
    return %c0_i32, %c0_i32_0 : i32, i32
  }
}

</mosaic_0001>

<bundles_post_ra>
// kernel: tpu_custom_call.1
= control target key start
LH: loop header
LB: loop body
LE: loop exit
PB: predicated region body
PF: predicated region fallthrough
CT: control target
= control target key end

     0   :  { %11 = vsyncpa [#allocation6], 0  ;;  %s1146_s0 = inlined_call_operand.hbm [shape: f32[8,4,256], index: 0, kind: input, shape index: {}]   ;;  %s1147_s1 = inlined_call_operand.vmem [shape: f32[8,1,2], index: 1, kind: input, shape index: {}]   ;;  %s1148_s2 = inlined_call_operand.vmem [shape: f32[2,4], index: 2, kind: input, shape index: {}]   ;;  %s1149_s3 = inlined_call_operand.vmem [shape: f32[2,4], index: 3, kind: input, shape index: {}]   ;;  %s1150_s4 = inlined_call_operand.hbm [shape: f32[2,4], index: 4, kind: output, shape index: {0}]   ;;  %s1151_s5 = inlined_call_operand.hbm [shape: f32[2,4], index: 5, kind: output, shape index: {1}]  }
   0x1   :  { %13 = vsyncpa [#allocation6 + $0x1], 0 }
   0x2   :  { %14 = vsyncpa [#allocation7], 0 }
   0x3   :  { %15 = vsyncpa [#allocation10], 0  ;;  %s992_s18 = smov 0   ;;  %s994_s19 = smov 0  }
   0x4   :  { %s996_s20 = smov 0   ;;  %s998_s21 = smov 0  }
   0x5   :  { %s1000_s22 = smov 0   ;;  %s1002_s23 = smov 0  }
   0x6 LB: > { %s701_s24 = sadd.s32 4294967295, %s953_s23   ;;  %s33_s25 = sadd.s32 1, %s949_s22  ;;  %s953_s23 = sphi %s1002_s23, %s21_s23   ;;  %s949_s22 = sphi %s1000_s22, %s1159_s22   ;;  %s945_s21 = sphi %s998_s21, %s1158_s21   ;;  %s941_s20 = sphi %s996_s20, %s1157_s20   ;;  %s937_s19 = sphi %s994_s19, %s1156_s19   ;;  %s933_s18 = sphi %s992_s18, %s1155_s18  }
   0x7   : > { %p35_p0 = scmp.ge.s32.totalorder %s33_s25, 2  ;;  %s42_s26 = sadd.s32 1, %s941_s20 }
   0x8   : > { %p49_p1 = scmp.ne.s32.totalorder %s941_s20, %s937_s19  ;;  %p50_p2 = scmp.eq.s32.totalorder %s953_s23, 0 }
   0x9   : > { %s1161_s25 = smov (%p35_p0, %s33_s25), 0  ;;  %p55_p4 = scmp.ne.s32.totalorder %s937_s19, %s933_s18 }
   0xa   : > { %p1028_p3 = por %p50_p2, %p49_p1  ;;  %s37_s28 = ssub.s32 %s949_s22, %s1161_s25 }
   0xb   : > { %p56_p5 = scmp.eq.s32.totalorder %s701_s24, 0  ;;  %p40_p6 = scmp.eq.s32.totalorder %s37_s28, 0 }
   0xc   : > { %p743_p8 = scmp.lt.s32.totalorder %s953_s23, 2  ;;  %s195_s6 = sand.u32 1, %s941_s20  }
   0xd   : > { %p1037_p7 = por %p56_p5, %p55_p4  ;;  %s726_s7 = sshll.u32 %s949_s22, 5 }
   0xe   : > { %s1043_s30 = scalar_select %p40_p6, %s941_s20, %s42_s26  }
   0xf   : > { %s704_s8 = sshll.u32 %s195_s6, 5  ;;  %s207_s11 = scalar_lea.hbm %s1146_s0, %s726_s7 }
  0x10   : > { %s208_s12 = sshll.u32 %s207_s11, 4  ;;  %s199_s13 = scalar_lea.vmem [#allocation5], %s704_s8  ;;  %s209_s12 = int_to_ptr.hbm [resolvable:$true] %s208_s12 }
  0x11   : > { %s210_s14 = sshll.u32 %s199_s13, 4  ;;  %p740_p9 = pnand %p743_p8, %p1028_p3  ;;  %s211_s14 = int_to_ptr.vmem [resolvable:$true] %s210_s14 }
  0x12   : > { %p708_p10 = scmp.ge.s32.totalorder %s953_s23, 1  ;;  %p226_p11 = scmp.lt.s32.totalorder %s953_s23, 3 }
  0x13   : > { %s196_s15 = scalar_lea.sflag [#allocation6], %s195_s6  ;;  %s955_s16 = smov 128  }
  0x14   : > { %s956_s17 = smov 8   ;;  %p227_p12 = pnand %p708_p10, %p226_p11 }
  0x15   : > { %742 = dma.hbm_to_vmem [thread:$0]  (!%p740_p9), %s209_s12, 512, %s211_s14, %s196_s15, %s955_s16, %s955_s16, %s956_s17  }
  0x16   : > { %230 = sbr.rel (%p227_p12) target bundleno = 574 (0x23e), region = 36  ;;  %s232_s18 = sand.u32 (!%p227_p12), 1, %s937_s19  }
  0x17   : > { %s709_s26 = sshll.u32 (!%p227_p12), %s232_s18, 5  ;;  %s233_s28 = scalar_lea.sflag (!%p227_p12), [#allocation6], %s232_s18 }
  0x18   : > { %s236_s7 = scalar_lea.vmem (!%p227_p12), [#allocation5], %s709_s26 }
  0x1b   : > { %920 = dma.done.wait (%p1037_p7), %s233_s28, 512  }
  0x1c   : > { %922 = vsyncadd (%p1037_p7), %s233_s28, 4294966784  ;;  %s710_s27 = sshll.u32 %s945_s21, 2  ;;  %p270_p13 = scmp.eq.s32.totalorder %s945_s21, 0 }
  0x1d   : > { %p266_p0 = scmp.lt.s32.totalorder %s710_s27, 7  ;;  %p274_p1 = scmp.eq.s32.totalorder %s945_s21, 1  ;;  %vm279_vm0 = vcmask (%p270_p13), 25600   ;;  %vm282_vm1 = vcmask (%p270_p13), 1024   ;;  %v957_v0 = vmov (%p270_p13), 0.0  }
  0x1e   : > { %278 = sbr.rel (!%p270_p13) target bundleno = 35 (0x23), region = 44  ;;  %280 = vst.msk [vmem:[#allocation2] sm:$0x3] (%p270_p13), %vm279_vm0, %v957_v0 }
  0x1f   : > { %s1163_s27 = smov (!%p266_p0, %s710_s27), 7  ;;  %281 = vst.msk [vmem:[#allocation3] sm:$0x3] (%p270_p13), %vm279_vm0, %v957_v0 }
  0x20   : > { %s1065_s9 = scalar_lea.vmem %s1147_s1, %s1163_s27  ;;  %283 = vst.msk [vmem:[#allocation4] sm:$0x3] (%p270_p13), %vm282_vm1, %v957_v0 }
  0x23 PF: > { %v286_v1 = vld [vmem:[%s236_s7 + $0x10] sm:$0xff]  ;;  %v284_v2 = vld [vmem:[%s236_s7] sm:$0xff]  ;;  %v285_v3 = vld [vmem:[%s236_s7 + $0x8] sm:$0xff]  ;;  %vm319_vm2 = vcmask 1043456   ;;  %v958_v54 = vmov 1.0   ;;  %v441_v56 = vlaneseq  ;;  %vm447_vm3 = vcmask 1041409  }
  0x24   : > { %304 = vst [vmem:[#allocation1 + $0x20] ss:$2 sm:$0xff] %v286_v1  ;;  %v287_v4 = vld [vmem:[%s236_s7 + $0x18] sm:$0xff]  ;;  %v342_v5 = vmul.f32 %v286_v1, %v286_v1  ;;  %v340_v6 = vmul.f32 %v284_v2, %v284_v2  ;;  %v341_v11 = vmul.f32 %v285_v3, %v285_v3  ;;  %v288_v35 = vld [vmem:[%s1065_s9] sm:$0x1]  ;;  %717 = vmatpush.msk.msra.mxu2 %vm319_vm2, %v958_v54  ;;  %vm449_vm4 = vcmask 1042434  }
  0x25   : > { %296 = vst [vmem:[#allocation1] ss:$2 sm:$0xff] %v284_v2  ;;  %v343_v17 = vmul.f32 %v287_v4, %v287_v4  ;;  %v289_v39 = vld [vmem:[%s1065_s9 + $0x1] sm:$0x1]  ;;  %v290_v40 = vld [vmem:[%s1065_s9 + $0x2] sm:$0x1] }
  0x26   : > { %300 = vst [vmem:[#allocation1 + $0x10] ss:$2 sm:$0xff] %v285_v3  ;;  %v291_v41 = vld [vmem:[%s1065_s9 + $0x3] sm:$0x1]  ;;  %v442_v59 = vand.u32 127, %v441_v56  ;;  %vm451_vm5 = vcmask 1043459  }
  0x27   : > { %308 = vst [vmem:[#allocation1 + $0x30] ss:$2 sm:$0xff] %v287_v4  ;;  %vm453_vm6 = vcmask 31744   ;;  %vm480_vm7 = vcmask 25600   ;;  %vm546_vm8 = vcmask 1024  }
  0x2b   : > { %v305_v7 = vld.sshfl [vmem:[#allocation1 + $0x20] sm:$0xff pattern:$0x75316420]  ;;  %v306_v8 = vld.sshfl [vmem:[#allocation1 + $0x28] sm:$0xff pattern:$0x75316420] }
  0x2c   : > { %v330_v9 = vsel %vm319_vm2, %v305_v7, 0.0  ;;  %v331_v10 = vsel %vm319_vm2, %v306_v8, 0.0  ;;  %356 = vst [vmem:[#allocation1 + $0x20] ss:$2 sm:$0xff] %v342_v5 }
  0x2d   : > { %v332_v12 = vadd.f32 %v331_v10, %v330_v9  ;;  %v297_v13 = vld.sshfl [vmem:[#allocation1] sm:$0xff pattern:$0x75316420]  ;;  %v298_v14 = vld.sshfl [vmem:[#allocation1 + $0x8] sm:$0xff pattern:$0x75316420] }
  0x2e   : > { %v320_v15 = vsel %vm319_vm2, %v297_v13, 0.0  ;;  %v321_v16 = vsel %vm319_vm2, %v298_v14, 0.0  ;;  %348 = vst [vmem:[#allocation1] ss:$2 sm:$0xff] %v340_v6 }
  0x2f   : > { %333 = vadd.xlane.f32.xlu2 %v332_v12  ;;  %v322_v18 = vadd.f32 %v321_v16, %v320_v15  ;;  %v301_v19 = vld.sshfl [vmem:[#allocation1 + $0x10] sm:$0xff pattern:$0x75316420]  ;;  %v302_v20 = vld.sshfl [vmem:[#allocation1 + $0x18] sm:$0xff pattern:$0x75316420] }
  0x30   : > { %352 = vst [vmem:[#allocation1 + $0x10] ss:$2 sm:$0xff] %v341_v11  ;;  %v309_v21 = vld.sshfl [vmem:[#allocation1 + $0x30] sm:$0xff pattern:$0x75316420]  ;;  %v325_v23 = vsel %vm319_vm2, %v301_v19, 0.0 }
  0x31   : > { %323 = vadd.xlane.f32.xlu0 %v322_v18  ;;  %v310_v22 = vld.sshfl [vmem:[#allocation1 + $0x38] sm:$0xff pattern:$0x75316420]  ;;  %v326_v24 = vsel %vm319_vm2, %v302_v20, 0.0  ;;  %v335_v46 = vsel %vm319_vm2, %v309_v21, 0.0 }
  0x32   : > { %360 = vst [vmem:[#allocation1 + $0x30] ss:$2 sm:$0xff] %v343_v17  ;;  %v327_v32 = vadd.f32 %v326_v24, %v325_v23  ;;  %v336_v47 = vsel %vm319_vm2, %v310_v22, 0.0  ;;  %v391_v16 = vld [vmem:[#allocation2] sm:$0x3] }
  0x33   : > { %v357_v25 = vld.sshfl [vmem:[#allocation1 + $0x20] sm:$0xff pattern:$0x75316420]  ;;  %v358_v26 = vld.sshfl [vmem:[#allocation1 + $0x28] sm:$0xff pattern:$0x75316420]  ;;  %v337_v49 = vadd.f32 %v336_v47, %v335_v46 }
  0x34   : > { %v381_v27 = vsel %vm319_vm2, %v357_v25, 0.0  ;;  %v382_v28 = vsel %vm319_vm2, %v358_v26, 0.0  ;;  %v482_v17 = vld [vmem:[#allocation3] sm:$0x3]  ;;  %v521_v22 = vld [vmem:[#allocation4] sm:$0x3] }
  0x35   : > { %v383_v29 = vadd.f32 %v382_v28, %v381_v27  ;;  %v349_v30 = vld.sshfl [vmem:[#allocation1] sm:$0xff pattern:$0x75316420]  ;;  %v350_v31 = vld.sshfl [vmem:[#allocation1 + $0x8] sm:$0xff pattern:$0x75316420] }
  0x36   : > { %v371_v33 = vsel %vm319_vm2, %v349_v30, 0.0  ;;  %v372_v34 = vsel %vm319_vm2, %v350_v31, 0.0  ;;  %v959_v26 = vmov (%p274_p1), 0  }
  0x37   : > { %384 = vadd.xlane.f32.xlu2 %v383_v29  ;;  %v373_v36 = vadd.f32 %v372_v34, %v371_v33  ;;  %v353_v37 = vld.sshfl [vmem:[#allocation1 + $0x10] sm:$0xff pattern:$0x75316420]  ;;  %v354_v38 = vld.sshfl [vmem:[#allocation1 + $0x18] sm:$0xff pattern:$0x75316420]  ;;  %804 = vset.pattern.permute.xlu0 (%p274_p1), %v959_v26 }
  0x38   : > { %v376_v44 = vsel %vm319_vm2, %v353_v37, 0.0  ;;  %v377_v45 = vsel %vm319_vm2, %v354_v38, 0.0 }
  0x39   : > { %374 = vadd.xlane.f32.xlu1 %v373_v36  ;;  %328 = vadd.xlane.f32.xlu0 %v327_v32  ;;  %v361_v42 = vld.sshfl [vmem:[#allocation1 + $0x30] sm:$0xff pattern:$0x75316420]  ;;  %v362_v43 = vld.sshfl [vmem:[#allocation1 + $0x38] sm:$0xff pattern:$0x75316420]  ;;  %v378_v48 = vadd.f32 %v377_v45, %v376_v44 }
  0x3a   : > { %396 = vst [vmem:[#allocation1] ss:$9 sm:$0xff] %v288_v35  ;;  %v386_v50 = vsel %vm319_vm2, %v361_v42, 0.0  ;;  %v387_v51 = vsel %vm319_vm2, %v362_v43, 0.0 }
  0x3b   : > { %398 = vst [vmem:[#allocation1 + $0x1] ss:$9 sm:$0xff] %v289_v39  ;;  %v388_v52 = vadd.f32 %v387_v51, %v386_v50 }
  0x3c   : > { %400 = vst [vmem:[#allocation1 + $0x2] ss:$9 sm:$0xff] %v290_v40 }
  0x3d   : > { %402 = vst [vmem:[#allocation1 + $0x3] ss:$9 sm:$0xff] %v291_v41 }
  0x41   : > { %379 = vadd.xlane.f32.xlu1 %v378_v48  ;;  %338 = vadd.xlane.f32.xlu0 %v337_v49 }
  0x44   : > { %v403_v53 = vld [vmem:[#allocation1] sm:$0xff] }
  0x49   : > { %389 = vadd.xlane.f32.xlu1 %v388_v52 }
  0x60   : > { %405 = vxpose.xlu2.b32.start.end [1/1] (short) (narrow) %v403_v53, 8  ;;  %v590_v53 = vld [vmem:[%s1148_s2] sm:$0x3] (%p274_p1) }
  0xa2   : > { %v334_v60 = vpop.xlane.xlu2 %333 }
  0xa3   : > { %v445_v0 = vperm.slane %v334_v60, %v442_v59 }
  0xa4   : > { %v324_v55 = vpop.xlane.xlu0 %323 }
  0xa5   : > { %v443_v61 = vperm.slane %v324_v55, %v442_v59 }
  0xaa   : > { %v385_v8 = vpop.xlane.xlu2 %384 }
  0xab   : > { %v489_v10 = vperm.slane %v385_v8, %v442_v59 }
  0xac   : > { %v375_v57 = vpop.xlane.xlu1 %374  ;;  %v329_v58 = vpop.xlane.xlu0 %328 }
  0xad   : > { %v444_v62 = vperm.slane %v329_v58, %v442_v59  ;;  %v487_v5 = vperm.slane %v375_v57, %v442_v59  ;;  %v593_v57 = vld [vmem:[%s1149_s3] sm:$0x3] (%p274_p1) }
  0xaf   : > { %v448_v63 = vsel %vm447_vm3, %v444_v62, %v443_v61 }
  0xb0   : > { %v450_v4 = vsel %vm449_vm4, %v445_v0, %v448_v63 }
  0xb4   : > { %v380_v1 = vpop.xlane.xlu1 %379  ;;  %v339_v2 = vpop.xlane.xlu0 %338 }
  0xb5   : > { %v446_v3 = vperm.slane %v339_v2, %v442_v59  ;;  %v488_v6 = vperm.slane %v380_v1, %v442_v59 }
  0xb7   : > { %v452_v7 = vsel %vm451_vm5, %v446_v3, %v450_v4  ;;  %v491_v9 = vsel %vm447_vm3, %v488_v6, %v487_v5 }
  0xb8   : > { %713 = vmatpush.msk.msra.mxu0 %vm319_vm2, %v452_v7  ;;  %v492_v13 = vsel %vm449_vm4, %v489_v10, %v491_v9 }
  0xbc   : > { %v390_v11 = vpop.xlane.xlu1 %389 }
  0xbd   : > { %v490_v12 = vperm.slane %v390_v11, %v442_v59 }
  0xbf   : > { %v493_v14 = vsel %vm451_vm5, %v490_v12, %v492_v13 }
  0xc0   : > { %715 = vmatpush.msk.msra.mxu1 %vm319_vm2, %v493_v14 }
  0xf9   : > { %v421_v15 = vpop.trf.xlu2 }
  0xfa   : > { %714 = vmatmul.msk.f32.vlgmr.msra.gmra.mxu0 %vm453_vm6, %v421_v15  ;;  %716 = vmatmul.msk.f32.vlgmr.msra.gmra.mxu1 %vm453_vm6, %v421_v15 }
  0xfb   : > { %718 = vmatmul.msk.f32.vlgmr.msra.gmra.mxu2 %vm453_vm6, %v421_v15 }
 0x177   : > { %v476_v18 = vpop.f32.mrf.mxu0  ;;  %v513_v19 = vpop.f32.mrf.mxu1 }
 0x178   : > { %v479_v20 = vadd.f32 %v476_v18, %v391_v16  ;;  %v516_v21 = vadd.f32 %v513_v19, %v482_v17 }
 0x17a   : > { %481 = vst.msk [vmem:[#allocation2] sm:$0x3] %vm480_vm7, %v479_v20 }
 0x17b   : > { %517 = vst.msk [vmem:[#allocation3] sm:$0x3] %vm480_vm7, %v516_v21 }
 0x17d   : > { %549 = sbr.rel (!%p274_p1) target bundleno = 564 (0x234), region = 52 }
 0x17e   : > { %v542_v23 = vpop.f32.mrf.mxu2 }
 0x17f   : > { %v545_v24 = vadd.f32 %v542_v23, %v521_v22 }
 0x181   : > { %547 = vst.msk [vmem:[#allocation4] sm:$0x3] %vm546_vm8, %v545_v24  ;;  %v553_v37 = vld [vmem:[#allocation2] sm:$0x3] (%p274_p1) }
 0x182   : > { %v574_v40 = vld [vmem:[#allocation3] sm:$0x3] }
 0x188   : > { %v550_v25 = vld [vmem:[#allocation4] sm:$0x3] }
 0x189   : > { %v551_v27 = vmul.f32 256.0, %v550_v25 }
 0x18b   : > { %v552_v28 = vmax.f32 %v551_v27, 1.0 }
 0x18d   : > { %556 = vperm.xlu0 %804, %v552_v28  }
 0x1ff   : > { %v557_v29 = vpop.permute.xlu0 %556 }
 0x200   : > { %805 = vrcp.f32 %v557_v29  ;;  %v570_v33 = vand.u32 2147483648, %v557_v29  ;;  %v568_v35 = vand.u32 2147483647, %v557_v29  ;;  %vm564_vm10 = vweird.f32 %v557_v29 }
 0x202   : > { %v571_v38 = vor.u32 1.1754944e-38, %v570_v33  ;;  %vm569_vm12 = vcmp.eq.f32.partialorder %v568_v35, 8.507059e+37 }
 0x206   : > { %v806_v30 = vpop.eup %805 }
 0x207   : > { %v560_v31 = vmul.f32 %v806_v30, %v557_v29  ;;  %vm565_vm9 = vweird.f32 %v806_v30 }
 0x208   : > { %vm566_vm11 = vmor %vm564_vm10, %vm565_vm9 }
 0x209   : > { %v561_v32 = vsub.f32 1.0, %v560_v31 }
 0x20b   : > { %v562_v34 = vmul.f32 %v806_v30, %v561_v32 }
 0x20d   : > { %v563_v36 = vadd.f32 %v806_v30, %v562_v34 }
 0x20f   : > { %v567_v39 = vsel %vm566_vm11, %v806_v30, %v563_v36 }
 0x210   : > { %v572_v41 = vsel %vm569_vm12, %v571_v38, %v567_v39 }
 0x211   : > { %v573_v42 = vmul.f32 %v572_v41, %v553_v37  ;;  %v575_v43 = vmul.f32 %v574_v40, %v572_v41 }
 0x213   : > { %v576_v44 = vmul.f32 %v573_v42, %v573_v42 }
 0x215   : > { %v577_v45 = vsub.f32 %v575_v43, %v576_v44 }
 0x217   : > { %v578_v46 = vmax.f32 %v577_v45, 0.0 }
 0x219   : > { %v579_v47 = vadd.f32 1e-05, %v578_v46 }
 0x21b   : > { %807 = vrsqrt.f32 %v579_v47  ;;  %vm586_vm14 = vweird.f32 %v579_v47 }
 0x221   : > { %v808_v48 = vpop.eup %807 }
 0x222   : > { %v581_v49 = vmul.f32 %v808_v48, %v579_v47  ;;  %vm587_vm13 = vweird.f32 %v808_v48 }
 0x223   : > { %vm588_vm15 = vmor %vm586_vm14, %vm587_vm13 }
 0x224   : > { %v582_v50 = vmul.f32 %v808_v48, %v581_v49 }
 0x226   : > { %v583_v51 = vmul.f32 0.5, %v582_v50 }
 0x228   : > { %v584_v52 = vsub.f32 1.5, %v583_v51 }
 0x22a   : > { %v585_v54 = vmul.f32 %v808_v48, %v584_v52 }
 0x22c   : > { %v589_v55 = vsel %vm588_vm15, %v808_v48, %v585_v54 }
 0x22d   : > { %v591_v56 = vmul.f32 %v590_v53, %v589_v55 }
 0x22f   : > { %592 = vst.msk [vmem:[#allocation8] sm:$0x3] %vm480_vm7, %v591_v56  ;;  %v594_v58 = vmul.f32 %v591_v56, %v573_v42 }
 0x231   : > { %v595_v59 = vsub.f32 %v593_v57, %v594_v58 }
 0x233   : > { %596 = vst.msk [vmem:[#allocation9] sm:$0x3] %vm480_vm7, %v595_v59 }
 0x234 PF: > { %p1106_p2 = scmp.eq.s32.totalorder %s701_s24, 1  ;;  %s605_s15 = sshll.u32 %s1150_s4, 4  ;;  %s606_s15 = int_to_ptr.hbm [resolvable:$true] %s605_s15 }
 0x235   : > { %s960_s16 = smov [#allocation8]   ;;  %s961_s18 = smov [#allocation9]  }
 0x236   : > { %s603_s17 = sshll.u32 %s960_s16, 4  ;;  %s615_s26 = sshll.u32 %s961_s18, 4  ;;  %s604_s17 = int_to_ptr.vmem [resolvable:$true] %s603_s17  ;;  %s616_s26 = int_to_ptr.vmem [resolvable:$true] %s615_s26 }
 0x237   : > { %732 = dma.vmem_to_hbm [thread:$0]  (%p1106_p2), %s604_s17, 32, %s606_s15, [#allocation7]  }
 0x238   : > { %s617_s7 = sshll.u32 %s1151_s5, 4  ;;  %s618_s7 = int_to_ptr.hbm [resolvable:$true] %s617_s7 }
 0x239   : > { %734 = dma.vmem_to_hbm [thread:$0]  (%p1106_p2), %s616_s26, 32, %s618_s7, [#allocation10]  }
 0x23a   : > { %924 = dma.done.wait (%p1106_p2), [#allocation7], 32  }
 0x23b   : > { %926 = vsyncadd (%p1106_p2), [#allocation7], 4294967264 }
 0x23c   : > { %928 = dma.done.wait (%p1106_p2), [#allocation10], 32  }
 0x23d   : > { %930 = vsyncadd (%p1106_p2), [#allocation10], 4294967264 }
 0x23e PF: > { %s21_s23 = sadd.s32 1, %s953_s23   ;;  %s1155_s18 = smov %s937_s19 }
 0x23f   : > { %p18_p3 = scmp.ge.s32.totalorder %s21_s23, 4   ;;  %s1156_s19 = smov %s941_s20 }
 0x240   : > { %s1157_s20 = smov %s1043_s30  ;;  %s1158_s21 = smov %s949_s22 }
 0x241   : > { %s1159_s22 = smov %s1161_s25  ;;  %20 = sbr.rel (!%p18_p3) target bundleno = 6 (0x6), region = 105 }
 0x246   :  { %636 = vsyncpa [#allocation6], 1 }
 0x247   :  { %638 = vsyncpa [#allocation6 + $0x1], 1 }
 0x248   :  { %639 = vsyncpa [#allocation7], 1 }
 0x249   :  { %641 = vsyncpa [#allocation7 + $0x1], 1 }
 0x24a   :  { %642 = vsyncpa [#allocation10], 1 }

</bundles_post_ra>
